<compile_context>
chip_gen: v6e
topology: v6e:2x2x1
jax: 0.10.0
libtpu: 0.0.40
codegen_flags: <defaults>
</compile_context>

<pallas_src>
import functools

import jax
import jax.numpy as jnp
from jax.experimental import pallas as pl
from jax.experimental.pallas import tpu as pltpu


_N_SLOTS = 32                 # outstanding row DMAs per grid step (HBM path)
_MAX_PREFETCH_IDS = 32 * 1024  # ids resident in SMEM per pallas_call (128 KiB)


def _round_up(x: int, m: int) -> int:
    return (x + m - 1) // m * m


# --------------------------------------------------------------------------
# Path A: whole embedding table resident in VMEM (small / medium tables).
# Gather 8 rows at a time and store dense (8, H) blocks (full-sublane vst).
# --------------------------------------------------------------------------
def _vmem_gather_kernel(ids_ref, table_ref, out_ref, *, tokens_per_step):
    T = tokens_per_step
    base = pl.program_id(0) * T

    def body(blk, carry):
        off = pl.multiple_of(blk * 8, 8)
        rows = [table_ref[ids_ref[base + off + j], :] for j in range(8)]
        out_ref[pl.ds(off, 8), :] = jnp.stack(rows, axis=0)
        return carry

    jax.lax.fori_loop(0, T // 8, body, 0)


# --------------------------------------------------------------------------
# Path B: table stays in HBM; per-row DMAs land DIRECTLY in the output block.
# Up to _N_SLOTS copies are kept in flight to cover HBM latency.
# --------------------------------------------------------------------------
def _dma_gather_kernel(ids_ref, table_hbm, out_ref, sem,
                       *, tokens_per_step, n_slots, n_ids):
    T = tokens_per_step
    base = pl.program_id(0) * T

    def start_row(dst_t, src_row, slot):
        pltpu.make_async_copy(
            table_hbm.at[src_row],   # one (H,) row in HBM
            out_ref.at[dst_t],       # its row in the (T, H) output block
            sem.at[slot],
        ).start()

    # Prime: issue the first n_prime row fetches back-to-back (static unroll).
    n_prime = min(n_slots, T)
    for t in range(n_prime):
        start_row(t, ids_ref[base + t], t)

    # Steady state: wait oldest copy on this slot, immediately reissue.
    def drain(t, carry):
        slot = t % n_slots
        t_next = t + n_slots
        # Read the next id BEFORE the wait (wait breaks SMEM sst->sld fwd).
        next_row = ids_ref[jnp.minimum(base + t_next, n_ids - 1)]
        # Same-shaped descriptor is sufficient for the wait.
        pltpu.make_async_copy(table_hbm.at[0], out_ref.at[t], sem.at[slot]).wait()

        @pl.when(t_next < T)
        def _():
            start_row(t_next, next_row, slot)

        return carry

    jax.lax.fori_loop(0, T, drain, 0, unroll=4)


# --------------------------------------------------------------------------
# One pallas_call over a (chunk of the) flattened token axis.
# --------------------------------------------------------------------------
def _run_chunk(ids_chunk, table, *, T, use_vmem_table, vmem_limit):
    (n_pad,) = ids_chunk.shape
    n_tiles = n_pad // T
    V, H = table.shape
    itemsize = jnp.dtype(table.dtype).itemsize

    if use_vmem_table:
        grid_spec = pltpu.PrefetchScalarGridSpec(
            num_scalar_prefetch=1,
            grid=(n_tiles,),
            # Constant block index -> table fetched into VMEM once.
            in_specs=[pl.BlockSpec((V, H), lambda i, ids: (0, 0))],
            out_specs=pl.BlockSpec((T, H), lambda i, ids: (i, 0)),
        )
        kernel = functools.partial(_vmem_gather_kernel, tokens_per_step=T)
    else:
        grid_spec = pltpu.PrefetchScalarGridSpec(
            num_scalar_prefetch=1,
            grid=(n_tiles,),
            in_specs=[pl.BlockSpec(memory_space=pl.ANY)],   # table stays in HBM
            out_specs=pl.BlockSpec((T, H), lambda i, ids: (i, 0)),
            scratch_shapes=[pltpu.SemaphoreType.DMA((_N_SLOTS,))],
        )
        kernel = functools.partial(_dma_gather_kernel, tokens_per_step=T,
                                   n_slots=_N_SLOTS, n_ids=n_pad)

    cost = pl.CostEstimate(
        flops=0, transcendentals=0,
        bytes_accessed=2 * n_pad * H * itemsize + n_pad * 4)

    return pl.pallas_call(
        kernel,
        out_shape=jax.ShapeDtypeStruct((n_pad, H), table.dtype),
        grid_spec=grid_spec,
        compiler_params=pltpu.CompilerParams(
            dimension_semantics=("parallel",),
            vmem_limit_bytes=int(vmem_limit)),
        cost_estimate=cost,
    )(ids_chunk, table)


# --------------------------------------------------------------------------
# Wrapper
# --------------------------------------------------------------------------
def embedding_lookup(input_ids: jax.Array,
                     table: jax.Array,
                     *,
                     tokens_per_step: int = 512,
                     vmem_table_budget_bytes: int | None = None,
                     force_dma_gather: bool = False) -> jax.Array:
    """input_ids: (B, S) int;  table: (V, H)  ->  (B, S, H) in table.dtype."""
    B, S = input_ids.shape
    V, H = table.shape
    n_tok = B * S
    itemsize = jnp.dtype(table.dtype).itemsize
    row_bytes = H * itemsize

    # Explicit OOB policy: clamp ids into [0, V-1] (deterministic).
    # TODO(synk): torch.nn.Embedding raises on out-of-range ids; no in-kernel raise here.
    flat_ids = jnp.clip(input_ids.reshape(n_tok).astype(jnp.int32), 0, V - 1)

    # Generation-aware VMEM capacity (v5e/v6e 128 MiB, v7x 64 MiB).
    try:
        vmem_cap = int(getattr(pltpu.get_tpu_info(), "vmem_capacity_bytes",
                               64 << 20))
    except Exception:
        vmem_cap = 64 << 20
    if vmem_table_budget_bytes is None:
        vmem_table_budget_bytes = min(32 << 20, vmem_cap // 4)

    # Tokens per grid step: multiple of 8; don't over-pad tiny inputs; keep
    # >= 2 grid tiles when possible (v7x has 2 TCs on the "parallel" axis);
    # cap so the double-buffered (T, H) output block fits in ~35% of VMEM.
    T = _round_up(max(tokens_per_step, 8), 8)
    T = min(T, _round_up(n_tok, 8))
    if n_tok > 8:
        T = min(T, _round_up(-(-n_tok // 2), 8))
    out_budget = int(0.35 * vmem_cap)
    T_cap = max(8, (out_budget // (2 * row_bytes)) // 8 * 8)
    T = max(8, min(T, T_cap))

    table_bytes = V * H * itemsize
    use_vmem_table = (not force_dma_gather
                      and table_bytes <= vmem_table_budget_bytes
                      and 2 * table_bytes + 2 * T * row_bytes + (4 << 20)
                      <= int(0.7 * vmem_cap))

    vmem_need = (2 * table_bytes if use_vmem_table else 0) + 2 * T * row_bytes
    vmem_limit = min(int(0.75 * vmem_cap), max(vmem_need + (8 << 20), 32 << 20))

    # Chunk the token axis so at most _MAX_PREFETCH_IDS ids sit in SMEM at once.
    chunk_tok = max(T, (_MAX_PREFETCH_IDS // T) * T)
    outs = []
    for start in range(0, n_tok, chunk_tok):
        ids_c = flat_ids[start:start + chunk_tok]
        nc = ids_c.shape[0]
        n_pad = _round_up(nc, T)
        if n_pad != nc:
            ids_c = jnp.pad(ids_c, (0, n_pad - nc))   # pad ids gather row 0, sliced off
        out_c = _run_chunk(ids_c, table, T=T,
                           use_vmem_table=use_vmem_table, vmem_limit=vmem_limit)
        outs.append(out_c[:nc])

    out_flat = outs[0] if len(outs) == 1 else jnp.concatenate(outs, axis=0)
    return out_flat.reshape(B, S, H)


if __name__ == "__main__":
    # Deterministic synthetic parameters (no checkpoint load). Real ChatGLM is
    # 65024 x 4096 and always takes the HBM DMA-gather path.
    VOCAB, HIDDEN = 1024, 128

    key = jax.random.PRNGKey(0)
    k_tab, k_ids = jax.random.split(key)
    word_embeddings = jax.random.normal(k_tab, (VOCAB, HIDDEN), dtype=jnp.float32)

    for (B, S) in [(2, 8), (2, 40)]:
        k_ids, k = jax.random.split(k_ids)
        input_ids = jax.random.randint(k, (B, S), 0, VOCAB, dtype=jnp.int32)
        ref = word_embeddings[input_ids]   # same semantics as torch.nn.Embedding

        # Path A (table resident in VMEM, default at these shapes).
        out_vmem = jax.block_until_ready(embedding_lookup(input_ids, word_embeddings))
        assert out_vmem.shape == (B, S, HIDDEN)
        assert out_vmem.dtype == jnp.float32
        assert jnp.allclose(out_vmem, ref), "VMEM-table path mismatch vs reference"

        # Path B (HBM DMA-gather, forced so the large-table path is exercised).
        out_dma = jax.block_until_ready(
            embedding_lookup(input_ids, word_embeddings, force_dma_gather=True))
        assert jnp.allclose(out_dma, ref), "DMA-gather path mismatch vs reference"

    print("KERNEL_OK")
</pallas_src>

<mosaic_0001>
module attributes {stable_mosaic.version = 11 : i64} {
  func.func @_vmem_gather_kernel(%arg0: i32, %arg1: memref<16xi32, #tpu.memory_space<smem>>, %arg2: memref<1024x128xf32, #tpu.memory_space<vmem>>, %arg3: memref<8x128xf32, #tpu.memory_space<vmem>>) attributes {dimension_semantics = [#tpu.dimension_semantics<parallel>], iteration_bounds = array<i64: 2>, scalar_prefetch = 1 : i64, scratch_operands = 0 : i64, tpu.core_type = #tpu.core_type<tc>, window_params = [{pipeline_mode = #tpu.pipeline_mode<synchronous>, transform_indices = @transform_0, window_bounds = array<i64: 1024, 128>}, {transform_indices = @transform_1, window_bounds = array<i64: 8, 128>}]} {
    %c8_i32 = arith.constant 8 : i32
    %0 = arith.muli %arg0, %c8_i32 : i32
    %c0_i32 = arith.constant 0 : i32
    %c8_i32_0 = arith.constant 8 : i32
    %1 = arith.muli %c0_i32, %c8_i32_0 : i32
    %2 = tpu.assume_multiple %1, 8 : i32
    %3 = arith.addi %0, %2 : i32
    %c0_i32_1 = arith.constant 0 : i32
    %4 = arith.addi %3, %c0_i32_1 : i32
    %5 = arith.index_cast %4 : i32 to index
    %6 = memref.load %arg1[%5] : memref<16xi32, #tpu.memory_space<smem>>
    %7 = arith.index_cast %6 : i32 to index
    %c0 = arith.constant 0 : index
    %8 = vector.load %arg2[%7, %c0] : memref<1024x128xf32, #tpu.memory_space<vmem>>, vector<1x128xf32>
    %9 = vector.shape_cast %8 : vector<1x128xf32> to vector<128xf32>
    %10 = arith.addi %0, %2 : i32
    %c1_i32 = arith.constant 1 : i32
    %11 = arith.addi %10, %c1_i32 : i32
    %12 = arith.index_cast %11 : i32 to index
    %13 = memref.load %arg1[%12] : memref<16xi32, #tpu.memory_space<smem>>
    %14 = arith.index_cast %13 : i32 to index
    %c0_2 = arith.constant 0 : index
    %15 = vector.load %arg2[%14, %c0_2] : memref<1024x128xf32, #tpu.memory_space<vmem>>, vector<1x128xf32>
    %16 = vector.shape_cast %15 : vector<1x128xf32> to vector<128xf32>
    %17 = arith.addi %0, %2 : i32
    %c2_i32 = arith.constant 2 : i32
    %18 = arith.addi %17, %c2_i32 : i32
    %19 = arith.index_cast %18 : i32 to index
    %20 = memref.load %arg1[%19] : memref<16xi32, #tpu.memory_space<smem>>
    %21 = arith.index_cast %20 : i32 to index
    %c0_3 = arith.constant 0 : index
    %22 = vector.load %arg2[%21, %c0_3] : memref<1024x128xf32, #tpu.memory_space<vmem>>, vector<1x128xf32>
    %23 = vector.shape_cast %22 : vector<1x128xf32> to vector<128xf32>
    %24 = arith.addi %0, %2 : i32
    %c3_i32 = arith.constant 3 : i32
    %25 = arith.addi %24, %c3_i32 : i32
    %26 = arith.index_cast %25 : i32 to index
    %27 = memref.load %arg1[%26] : memref<16xi32, #tpu.memory_space<smem>>
    %28 = arith.index_cast %27 : i32 to index
    %c0_4 = arith.constant 0 : index
    %29 = vector.load %arg2[%28, %c0_4] : memref<1024x128xf32, #tpu.memory_space<vmem>>, vector<1x128xf32>
    %30 = vector.shape_cast %29 : vector<1x128xf32> to vector<128xf32>
    %31 = arith.addi %0, %2 : i32
    %c4_i32 = arith.constant 4 : i32
    %32 = arith.addi %31, %c4_i32 : i32
    %33 = arith.index_cast %32 : i32 to index
    %34 = memref.load %arg1[%33] : memref<16xi32, #tpu.memory_space<smem>>
    %35 = arith.index_cast %34 : i32 to index
    %c0_5 = arith.constant 0 : index
    %36 = vector.load %arg2[%35, %c0_5] : memref<1024x128xf32, #tpu.memory_space<vmem>>, vector<1x128xf32>
    %37 = vector.shape_cast %36 : vector<1x128xf32> to vector<128xf32>
    %38 = arith.addi %0, %2 : i32
    %c5_i32 = arith.constant 5 : i32
    %39 = arith.addi %38, %c5_i32 : i32
    %40 = arith.index_cast %39 : i32 to index
    %41 = memref.load %arg1[%40] : memref<16xi32, #tpu.memory_space<smem>>
    %42 = arith.index_cast %41 : i32 to index
    %c0_6 = arith.constant 0 : index
    %43 = vector.load %arg2[%42, %c0_6] : memref<1024x128xf32, #tpu.memory_space<vmem>>, vector<1x128xf32>
    %44 = vector.shape_cast %43 : vector<1x128xf32> to vector<128xf32>
    %45 = arith.addi %0, %2 : i32
    %c6_i32 = arith.constant 6 : i32
    %46 = arith.addi %45, %c6_i32 : i32
    %47 = arith.index_cast %46 : i32 to index
    %48 = memref.load %arg1[%47] : memref<16xi32, #tpu.memory_space<smem>>
    %49 = arith.index_cast %48 : i32 to index
    %c0_7 = arith.constant 0 : index
    %50 = vector.load %arg2[%49, %c0_7] : memref<1024x128xf32, #tpu.memory_space<vmem>>, vector<1x128xf32>
    %51 = vector.shape_cast %50 : vector<1x128xf32> to vector<128xf32>
    %52 = arith.addi %0, %2 : i32
    %c7_i32 = arith.constant 7 : i32
    %53 = arith.addi %52, %c7_i32 : i32
    %54 = arith.index_cast %53 : i32 to index
    %55 = memref.load %arg1[%54] : memref<16xi32, #tpu.memory_space<smem>>
    %56 = arith.index_cast %55 : i32 to index
    %c0_8 = arith.constant 0 : index
    %57 = vector.load %arg2[%56, %c0_8] : memref<1024x128xf32, #tpu.memory_space<vmem>>, vector<1x128xf32>
    %58 = vector.shape_cast %57 : vector<1x128xf32> to vector<128xf32>
    %59 = vector.shape_cast %9 : vector<128xf32> to vector<1x128xf32>
    %60 = vector.shape_cast %16 : vector<128xf32> to vector<1x128xf32>
    %61 = vector.shape_cast %23 : vector<128xf32> to vector<1x128xf32>
    %62 = vector.shape_cast %30 : vector<128xf32> to vector<1x128xf32>
    %63 = vector.shape_cast %37 : vector<128xf32> to vector<1x128xf32>
    %64 = vector.shape_cast %44 : vector<128xf32> to vector<1x128xf32>
    %65 = vector.shape_cast %51 : vector<128xf32> to vector<1x128xf32>
    %66 = vector.shape_cast %58 : vector<128xf32> to vector<1x128xf32>
    %67 = tpu.concatenate %59, %60, %61, %62, %63, %64, %65, %66 in 0 : vector<1x128xf32>, vector<1x128xf32>, vector<1x128xf32>, vector<1x128xf32>, vector<1x128xf32>, vector<1x128xf32>, vector<1x128xf32>, vector<1x128xf32> -> vector<8x128xf32>
    %68 = arith.index_cast %2 : i32 to index
    %c0_9 = arith.constant 0 : index
    %69 = vector.load %arg3[%68, %c0_9] : memref<8x128xf32, #tpu.memory_space<vmem>>, vector<8x128xf32>
    tpu.vector_store %arg3[%68, %c0_9], %67 {strides = array<i32>} : memref<8x128xf32, #tpu.memory_space<vmem>>, vector<8x128xf32>,
    %c1_i32_10 = arith.constant 1 : i32
    return
  }
  func.func @transform_0(%arg0: i32, %arg1: memref<16xi32, #tpu.memory_space<smem>>) -> (i32, i32) {
    %c0_i32 = arith.constant 0 : i32
    %c0_i32_0 = arith.constant 0 : i32
    %c0_i32_1 = arith.constant 0 : i32
    return %c0_i32, %c0_i32_0 : i32, i32
  }
  func.func @transform_1(%arg0: i32, %arg1: memref<16xi32, #tpu.memory_space<smem>>) -> (i32, i32) {
    %c0_i32 = arith.constant 0 : i32
    %c0_i32_0 = arith.constant 0 : i32
    return %arg0, %c0_i32 : i32, i32
  }
}

</mosaic_0001>

<bundles_post_ra>
// kernel: tpu_custom_call.1
= control target key start
LH: loop header
LB: loop body
LE: loop exit
PB: predicated region body
PF: predicated region fallthrough
CT: control target
= control target key end

     0   :  { %s431_s9 = smov [#allocation3]   ;;  %s575_s0 = inlined_call_operand.hbm [shape: s32[16], index: 0, kind: input, shape index: {}]   ;;  %s576_s1 = inlined_call_operand.hbm [shape: f32[1024,128], index: 1, kind: input, shape index: {}]   ;;  %s577_s2 = inlined_call_operand.hbm [shape: f32[16,128], index: 2, kind: output, shape index: {}]  }
   0x1   :  { %8 = dma.hbm_to_smem %s575_s0, 16, %s431_s9, [#allocation2] }
   0x2   :  { %405 = dma.done.wait [#allocation2], 16 }
   0x3   :  { %406 = vsyncadd [#allocation2], 4294967280 }
   0x4   :  { %10 = sfence }
   0x5   :  { %11 = vsyncpa [#allocation5], 0 }
   0x6   :  { %12 = vsyncpa [#allocation6], 0 }
   0x7   :  { %14 = vsyncpa [#allocation6 + $0x1], 0  ;;  %s454_s12 = smov 0   ;;  %s456_s13 = smov 0  }
   0x8   :  { %s458_s14 = smov 0   ;;  %s460_s15 = smov 0  }
   0x9 LB: > { %s475_s0 = sadd.s32 4294967295, %s429_s15   ;;  %s265_s16 = sadd.s32 4294967294, %s429_s15   ;;  %s429_s15 = sphi %s460_s15, %s585_s15   ;;  %s425_s14 = sphi %s458_s14, %s584_s14   ;;  %s421_s13 = sphi %s456_s13, %s583_s13   ;;  %s417_s12 = sphi %s454_s12, %s582_s12  }
   0xa   : > { %s479_s17 = sadd.s32 1, %s429_s15   ;;  %s48_s18 = sadd.s32 1, %s425_s14 }
   0xb   : > { %s45_s19 = ssub.s32 %s429_s15, %s479_s17  ;;  %p58_p0 = scmp.ne.s32.totalorder %s425_s14, %s421_s13 }
   0xc   : > { %p46_p1 = scmp.eq.s32.totalorder %s45_s19, 0  ;;  %p59_p2 = scmp.eq.s32.totalorder %s475_s0, 1 }
   0xd   : > { %p64_p3 = scmp.ne.s32.totalorder %s421_s13, %s417_s12  ;;  %p65_p4 = scmp.eq.s32.totalorder %s265_s16, 1 }
   0xe   : > { %s490_s20 = scalar_select %p46_p1, %s425_s14, %s48_s18  }
   0xf   : > { %p492_p5 = por %p59_p2, %p58_p0  ;;  %p496_p6 = por %p65_p4, %p64_p3 }
  0x10   : > { %p266_p7 = scmp.ge.s32.totalorder %s429_s15, 1  ;;  %p72_p8 = scmp.lt.s32.totalorder %s429_s15, 3 }
  0x11   : > { %s579_s22 = scalar_select %p496_p6, 1, 0 }
  0x12   : > { %p290_p9 = scmp.eq.s32.totalorder %s475_s0, 0  ;;  %p503_p10 = pnand %p266_p7, %p72_p8 }
  0x13   : > { %s432_s24 = smov [#allocation4]  }
  0x14   : > { %s84_s25 = sshll.u32 %s432_s24, 4  ;;  %p282_p11 = pneg %p503_p10  ;;  %s85_s25 = int_to_ptr.vmem [resolvable:$true] %s84_s25 }
  0x15   : > { %s348_s26 = scalar_lea.vmem %s85_s25, 16384  ;;  %p356_p3 = scmp.lt.s32.totalorder %s85_s25, %s85_s25 }
  0x16   : > { %p283_p12 = pnand %p290_p9, %p282_p11  ;;  %p349_p0 = scmp.ne.s32.totalorder %s85_s25, %s348_s26 }
  0x17   : > { %p357_p4 = scmp.lt.s32.totalorder %s348_s26, %s348_s26 }
  0x18   : > { %p339_p13 = pneg %p283_p12 }
  0x19   : > { %p358_p6 = por %p357_p4, %p356_p3 }
  0x1a   : > { %p351_p1 = pnand %p349_p0, %p339_p13 }
  0x1c   : > { %p352_p2 = pneg %p351_p1 }
  0x1e   : > { %p359_p7 = pnand %p358_p6, %p352_p2 }
  0x20   : > { %362 = shalt.err (!%p359_p7)
}
  0x21   : > { %s433_s27 = smov 128   ;;  %s434_s28 = smov 8  }
  0x22   : > { %285 = dma.hbm_to_vmem [thread:$0]  (!%p283_p12), %s576_s1, 16384, %s85_s25, [#allocation5], %s433_s27, %s433_s27, %s434_s28  }
  0x23   : > { %100 = sbr.rel (%p503_p10) target bundleno = 78 (0x4e), region = 24 }
  0x28   : > { %408 = dma.done.wait (%p290_p9), [#allocation5], 16384  }
  0x29   : > { %410 = vsyncadd (%p290_p9), [#allocation5], 4294950912  ;;  %s112_s3 = sand.u32 1, %s421_s13   ;;  %s271_s4 = sshll.u32 %s475_s0, 3  ;;  %vm169_vm0 = vcmask 1040384   ;;  %vm171_vm1 = vcmask 1041408  }
  0x2a   : > { %s117_s5 = sld [smem:[#allocation3 + %s271_s4]]  ;;  %s524_s6 = sshll.u32 %s112_s3, 3  ;;  %vm173_vm2 = vcmask 1042432   ;;  %vm175_vm3 = vcmask 1043456   ;;  %vm177_vm4 = vcmask 1044480   ;;  %vm179_vm5 = vcmask 1045504  }
  0x2b   : > { %s120_s7 = sadd.s32 1, %s271_s4  ;;  %s124_s9 = sadd.s32 2, %s271_s4  ;;  %vm181_vm6 = vcmask 1046528  }
  0x2c   : > { %s121_s8 = sld [smem:[#allocation3 + %s120_s7]]  ;;  %s128_s11 = sadd.s32 3, %s271_s4 }
  0x2d   : > { %s125_s10 = sld [smem:[#allocation3 + %s124_s9]]  ;;  %s132_s18 = sadd.s32 4, %s271_s4 }
  0x2e   : > { %s129_s16 = sld [smem:[#allocation3 + %s128_s11]]  ;;  %s136_s23 = sadd.s32 5, %s271_s4 }
  0x2f   : > { %s133_s19 = sld [smem:[#allocation3 + %s132_s18]]  ;;  %s140_s25 = sadd.s32 6, %s271_s4 }
  0x30   : > { %s137_s24 = sld [smem:[#allocation3 + %s136_s23]]  ;;  %s144_s26 = sadd.s32 7, %s271_s4 }
  0x31   : > { %s526_s27 = sld [smem:[#allocation3 + %s140_s25]]  ;;  %s118_s28 = scalar_lea.vmem [#allocation4], %s117_s5 }
  0x32   : > { %v119_v0 = vld [vmem:[%s118_s28] sm:$0x1]  ;;  %s122_s29 = scalar_lea.vmem [#allocation4], %s121_s8  ;;  %s528_s30 = sld [smem:[#allocation3 + %s144_s26]] }
  0x33   : > { %v123_v1 = vld [vmem:[%s122_s29] sm:$0x1]  ;;  %s126_s7 = scalar_lea.vmem [#allocation4], %s125_s10  ;;  %s114_s8 = scalar_lea.vmem [#allocation7], %s524_s6 }
  0x34   : > { %v127_v2 = vld [vmem:[%s126_s7] sm:$0x1]  ;;  %v149_v3 = vrot.slane %v123_v1, 7  ;;  %s130_s9 = scalar_lea.vmem [#allocation4], %s129_s16  ;;  %s198_s10 = sshll.u32 %s114_s8, 4  ;;  %s535_s10 = int_to_ptr.vmem [resolvable:$true] %s198_s10 }
  0x35   : > { %v131_v4 = vld [vmem:[%s130_s9] sm:$0x1]  ;;  %v152_v5 = vrot.slane %v127_v2, 6  ;;  %s134_s4 = scalar_lea.vmem [#allocation4], %s133_s19  ;;  %s273_s16 = sshll.u32 %s475_s0, 7 }
  0x36   : > { %v135_v6 = vld [vmem:[%s134_s4] sm:$0x1]  ;;  %v155_v7 = vrot.slane %v131_v4, 5  ;;  %v170_v8 = vsel %vm169_vm0, %v119_v0, %v149_v3  ;;  %s138_s5 = scalar_lea.vmem [#allocation4], %s137_s24  ;;  %s196_s6 = scalar_lea.hbm %s577_s2, %s273_s16 }
  0x37   : > { %v139_v9 = vld [vmem:[%s138_s5] sm:$0x1]  ;;  %v158_v10 = vrot.slane %v135_v6, 4  ;;  %v172_v11 = vsel %vm171_vm1, %v170_v8, %v152_v5  ;;  %s142_s11 = scalar_lea.vmem [#allocation4], %s526_s27  ;;  %s185_s0 = scalar_lea.sflag [#allocation6], %s112_s3 }
  0x38   : > { %v161_v12 = vrot.slane %v139_v9, 3  ;;  %v174_v13 = vsel %vm173_vm2, %v172_v11, %v155_v7  ;;  %v143_v14 = vld [vmem:[%s142_s11] sm:$0x1]  ;;  %s146_s18 = scalar_lea.vmem [#allocation4], %s528_s30  ;;  %s363_s24 = scalar_lea.vmem %s535_s10, 128 }
  0x39   : > { %v176_v15 = vsel %vm175_vm3, %v174_v13, %v158_v10  ;;  %v147_v16 = vld [vmem:[%s146_s18] sm:$0x1]  ;;  %v164_v17 = vrot.slane %v143_v14, 2  ;;  %p364_p6 = scmp.ne.s32.totalorder %s535_s10, %s363_s24  ;;  %s435_s25 = smov [#allocation7]  }
  0x3a   : > { %v178_v18 = vsel %vm177_vm4, %v176_v15, %v161_v12  ;;  %v167_v19 = vrot.slane %v147_v16, 1  ;;  %s367_s26 = sshll.u32 %s435_s25, 4  ;;  %s368_s26 = int_to_ptr.vmem [resolvable:$false] %s367_s26 }
  0x3b   : > { %v180_v20 = vsel %vm179_vm5, %v178_v18, %v164_v17  ;;  %p365_p8 = pnand %p364_p6, %p492_p5  ;;  %s369_s27 = scalar_lea.vmem %s368_s26, 256 }
  0x3c   : > { %v182_v21 = vsel %vm181_vm6, %v180_v20, %v167_v19  ;;  %p370_p10 = scmp.lt.s32.totalorder %s535_s10, %s368_s26  ;;  %p371_p11 = scmp.lt.s32.totalorder %s369_s27, %s363_s24 }
  0x3d   : > { %183 = vst [vmem:[%s114_s8] sm:$0xff] %v182_v21  ;;  %p366_p9 = pneg %p365_p8 }
  0x3e   : > { %p372_p12 = por %p371_p11, %p370_p10 }
  0x40   : > { %p373_p13 = pnand %p372_p12, %p366_p9 }
  0x42   : > { %376 = shalt.err (!%p373_p13)
}
  0x43   : > { %s377_s28 = scalar_lea.hbm %s196_s6, 128  ;;  %s381_s30 = scalar_lea.hbm %s577_s2, 256 }
  0x44   : > { %p378_p0 = scmp.ne.s32.totalorder %s196_s6, %s377_s28  ;;  %p382_p3 = scmp.lt.s32.totalorder %s196_s6, %s577_s2 }
  0x45   : > { %p383_p4 = scmp.lt.s32.totalorder %s381_s30, %s377_s28 }
  0x46   : > { %p379_p1 = pnand %p378_p0, %p492_p5 }
  0x47   : > { %p384_p7 = por %p383_p4, %p382_p3 }
  0x48   : > { %p380_p2 = pneg %p379_p1 }
  0x4a   : > { %p385_p6 = pnand %p384_p7, %p380_p2 }
  0x4c   : > { %388 = shalt.err (!%p385_p6)
}
  0x4d   : > { %280 = dma.vmem_to_hbm [thread:$0]  (%p492_p5), %s535_s10, 128, %s196_s6, %s185_s0  }
  0x4e PF: > { %p292_p8 = scmp.ge.s32.totalorder %s429_s15, 2  ;;  %s210_s4 = sand.u32 1, %s417_s12  }
  0x4f   : > { %p581_p9 = scmp.ne.s32.totalorder %s579_s22, 0  ;;  %s211_s5 = scalar_lea.sflag [#allocation6], %s210_s4 }
  0x51   : > { %p287_p10 = pnand %p292_p8, %p581_p9 }
  0x53   : > { %p288_p11 = pneg %p287_p10 }
  0x55   : > { %412 = dma.done.wait (%p288_p11), %s211_s5, 128  }
  0x56   : > { %414 = vsyncadd (%p288_p11), %s211_s5, 4294967168  ;;  %p17_p12 = scmp.ge.s32.totalorder %s479_s17, 4   ;;  %s582_s12 = smov %s421_s13 }
  0x57   : > { %s583_s13 = smov %s425_s14  ;;  %s584_s14 = smov %s490_s20 }
  0x58   : > { %s585_s15 = smov %s479_s17  ;;  %19 = sbr.rel (!%p17_p12) target bundleno = 9 (0x9), region = 69 }
  0x5d   :  { %216 = vsyncpa [#allocation5], 1 }
  0x5e   :  { %218 = vsyncpa [#allocation5 + $0x1], 1 }
  0x5f   :  { %219 = vsyncpa [#allocation6], 1 }
  0x60   :  { %221 = vsyncpa [#allocation6 + $0x1], 1 }

</bundles_post_ra>
